<compile_context>
chip_gen: v7x
topology: tpu7x:2x2x1
jax: 0.10.0
libtpu: 0.0.40
codegen_flags: <defaults>
</compile_context>

<pallas_src>
import jax
import jax.numpy as jnp
from jax.experimental import pallas as pl
from jax.experimental.pallas import tpu as pltpu


def ban_kernel(bsum_ref, v_ref, q_ref, wv_ref, bv_ref, wq_ref, bq_ref,
               hmat_ref, biasrow_ref, pool_ref, att_t_ref, logits_ref):
    """Fused BANLayer forward (softmax=False, h_out <= 32).

    bsum_ref:    (1,)             SMEM   sum_h h_bias[h]
    v_ref:       (Nv, v_dim)      VMEM
    q_ref:       (Nq, q_dim)      VMEM
    wv_ref:      (v_dim, Kp)      VMEM   (Kp = K padded to multiple of 128)
    bv_ref:      (1, Kp)          VMEM
    wq_ref:      (q_dim, Kp)      VMEM
    bq_ref:      (1, Kp)          VMEM
    hmat_ref:    (h_out, Kp)      VMEM
    biasrow_ref: (1, h_out*Nv)    VMEM   h_bias repeated Nv times per head
    pool_ref:    (Kp, h_dim)      VMEM   0/1 group-sum matrix (AvgPool1d(k)*k)
    att_t_ref:   (Nq, h_out*Nv)   VMEM out  (lane-dense attention, transposed)
    logits_ref:  (1, h_dim)       VMEM out
    """
    # FCNet: Dropout (identity in eval) -> weight_norm Linear -> ReLU.
    v_ = jnp.maximum(
        jnp.dot(v_ref[...], wv_ref[...], preferred_element_type=jnp.float32)
        + bv_ref[...], 0.0)                                      # (Nv, Kp)
    q_ = jnp.maximum(
        jnp.dot(q_ref[...], wq_ref[...], preferred_element_type=jnp.float32)
        + bq_ref[...], 0.0)                                      # (Nq, Kp)

    h_out, Kp = hmat_ref.shape
    Nv = v_.shape[0]

    # Batched attention: one (Nq, Kp) x (Kp, h_out*Nv) matmul instead of h_out tiny ones.
    # lhs[h*Nv + v, k] = h_mat[h, k] * v_[v, k]
    lhs = (hmat_ref[...][:, None, :] * v_[None, :, :]).reshape(h_out * Nv, Kp)
    att_t = jax.lax.dot_general(q_, lhs, (((1,), (1,)), ((), ())),
                                preferred_element_type=jnp.float32)   # (Nq, h_out*Nv)
    att_t_ref[...] = att_t + biasrow_ref[...]        # single broadcast bias add

    # attention_pooling summed over heads, using the head-summed bilinear form:
    #   A[v,q] = sum_h att[h,v,q] = sum_k (sum_h h_mat[h,k]) v_[v,k] q_[q,k] + sum_h b[h]
    hsum = jnp.sum(hmat_ref[...], axis=0, keepdims=True)             # (1, Kp)
    A = jax.lax.dot_general(v_ * hsum, q_, (((1,), (1,)), ((), ())),
                            preferred_element_type=jnp.float32) + bsum_ref[0]  # (Nv, Nq)
    t = jnp.dot(A, q_, preferred_element_type=jnp.float32)           # (Nv, Kp)
    fusion = jnp.sum(v_ * t, axis=0, keepdims=True)                  # (1, Kp)
    # AvgPool1d(k, stride=k) * k  ==  non-overlapping group-sum -> (1, h_dim)
    logits_ref[...] = jnp.dot(fusion, pool_ref[...],
                              preferred_element_type=jnp.float32)


def ban_forward(v, q, Wv, bv, Wq, bq, h_mat, h_bias, *, h_dim, k, softmax=False):
    if softmax:
        raise NotImplementedError("softmax=True branch not implemented")
    Nv = v.shape[0]
    Nq = q.shape[0]
    h_out, K = h_mat.shape
    assert K == h_dim * k
    assert h_out <= 32, "h_out > 32 (weight-normed h_net) branch not implemented"

    # Pad the fused-hidden dim to full 128-lane vregs; padded columns stay exactly 0
    # through ReLU / h_mat products, so results are unchanged.
    Kp = ((K + 127) // 128) * 128
    pad = Kp - K
    if pad:
        Wv = jnp.pad(Wv, ((0, 0), (0, pad)))
        Wq = jnp.pad(Wq, ((0, 0), (0, pad)))
        bv = jnp.pad(bv, ((0, 0), (0, pad)))
        bq = jnp.pad(bq, ((0, 0), (0, pad)))
        h_mat_p = jnp.pad(h_mat, ((0, 0), (0, pad)))
    else:
        h_mat_p = h_mat

    bias_row = jnp.repeat(h_bias, Nv)[None, :]                     # (1, h_out*Nv)
    bsum = jnp.sum(h_bias).reshape(1)                              # (1,)
    # 0/1 group-sum matrix: pool[i, d] = 1 iff i // k == d  (padded rows never match).
    pool = (jnp.arange(Kp)[:, None] // k
            == jnp.arange(h_dim)[None, :]).astype(jnp.float32)     # (Kp, h_dim)

    vmem = pl.BlockSpec(memory_space=pltpu.MemorySpace.VMEM)
    smem = pl.BlockSpec(memory_space=pltpu.MemorySpace.SMEM)
    att_t, logits = pl.pallas_call(
        ban_kernel,
        out_shape=(jax.ShapeDtypeStruct((Nq, h_out * Nv), jnp.float32),
                   jax.ShapeDtypeStruct((1, h_dim), jnp.float32)),
        in_specs=[smem, vmem, vmem, vmem, vmem, vmem, vmem, vmem, vmem, vmem],
        out_specs=(vmem, vmem),
    )(bsum, v, q, Wv, bv, Wq, bq, h_mat_p, bias_row, pool)

    # Recover the module's (1, h_out, Nv, Nq) attention layout (layout plumbing only).
    att_maps = att_t.T.reshape(h_out, Nv, Nq)[None]
    return logits, att_maps


if __name__ == "__main__":
    # Small shapes consistent with BANLayer's forward (batch = 1 implicit).
    Nv, Nq = 32, 16
    v_dim, q_dim = 32, 24
    h_dim, h_out, k_pool = 32, 4, 3
    K = h_dim * k_pool  # 96 -> padded to 128 inside the wrapper

    key = jax.random.PRNGKey(0)
    ks = jax.random.split(key, 8)
    v = jax.random.normal(ks[0], (Nv, v_dim), jnp.float32)
    q = jax.random.normal(ks[1], (Nq, q_dim), jnp.float32)
    # Deterministic synthetic parameters (weight_norm at init == the wrapped weight).
    Wv = jax.random.normal(ks[2], (v_dim, K), jnp.float32) * 0.1
    bv = jax.random.normal(ks[3], (1, K), jnp.float32) * 0.1
    Wq = jax.random.normal(ks[4], (q_dim, K), jnp.float32) * 0.1
    bq = jax.random.normal(ks[5], (1, K), jnp.float32) * 0.1
    h_mat = jax.random.normal(ks[6], (h_out, K), jnp.float32) * 0.1
    h_bias = jax.random.normal(ks[7], (h_out,), jnp.float32)

    logits, att_maps = ban_forward(v, q, Wv, bv, Wq, bq, h_mat, h_bias,
                                   h_dim=h_dim, k=k_pool)
    jax.block_until_ready((logits, att_maps))

    # Pure-JAX reference (mirrors the PyTorch forward).
    v_f = jax.nn.relu(v @ Wv + bv)
    q_f = jax.nn.relu(q @ Wq + bq)
    att_ref = jnp.einsum('hk,vk,qk->hvq', h_mat, v_f, q_f) + h_bias[:, None, None]
    fusion_ref = jnp.einsum('vk,hvq,qk->k', v_f, att_ref, q_f)
    logits_ref = fusion_ref.reshape(h_dim, k_pool).sum(-1)[None]

    assert att_maps.shape == (1, h_out, Nv, Nq)
    assert logits.shape == (1, h_dim)
    assert jnp.allclose(att_maps[0], att_ref, rtol=1e-3, atol=1e-3)
    assert jnp.allclose(logits, logits_ref, rtol=1e-3, atol=1e-2)

    print("KERNEL_OK")
</pallas_src>

<mosaic_0001>
module attributes {stable_mosaic.version = 11 : i64} {
  func.func @ban_kernel(%arg0: memref<1xf32, #tpu.memory_space<smem>>, %arg1: memref<32x32xf32, #tpu.memory_space<vmem>>, %arg2: memref<16x24xf32, #tpu.memory_space<vmem>>, %arg3: memref<32x128xf32, #tpu.memory_space<vmem>>, %arg4: memref<1x128xf32, #tpu.memory_space<vmem>>, %arg5: memref<24x128xf32, #tpu.memory_space<vmem>>, %arg6: memref<1x128xf32, #tpu.memory_space<vmem>>, %arg7: memref<4x128xf32, #tpu.memory_space<vmem>>, %arg8: memref<1x128xf32, #tpu.memory_space<vmem>>, %arg9: memref<128x32xf32, #tpu.memory_space<vmem>>, %arg10: memref<16x128xf32, #tpu.memory_space<vmem>>, %arg11: memref<1x32xf32, #tpu.memory_space<vmem>>) attributes {dimension_semantics = [], scalar_prefetch = 0 : i64, scratch_operands = 0 : i64, tpu.core_type = #tpu.core_type<tc>} {
    %c0 = arith.constant 0 : index
    %c0_0 = arith.constant 0 : index
    %0 = vector.load %arg1[%c0, %c0_0] : memref<32x32xf32, #tpu.memory_space<vmem>>, vector<32x32xf32>
    %c0_1 = arith.constant 0 : index
    %c0_2 = arith.constant 0 : index
    %1 = vector.load %arg3[%c0_1, %c0_2] : memref<32x128xf32, #tpu.memory_space<vmem>>, vector<32x128xf32>
    %cst = arith.constant dense<0.000000e+00> : vector<32x128xf32>
    %2 = tpu.matmul %0, %1, %cst {dimension_numbers = #tpu.dot_dimension_numbers<[1], [0], [0], [1], [0, 0, 1, 1], [], []>} : vector<32x32xf32>, vector<32x128xf32>, vector<32x128xf32> -> vector<32x128xf32>
    %c0_3 = arith.constant 0 : index
    %c0_4 = arith.constant 0 : index
    %3 = vector.load %arg4[%c0_3, %c0_4] : memref<1x128xf32, #tpu.memory_space<vmem>>, vector<1x128xf32>
    %4 = vector.broadcast %3 : vector<1x128xf32> to vector<32x128xf32>
    %5 = arith.addf %2, %4 : vector<32x128xf32>
    %cst_5 = arith.constant 0.000000e+00 : f32
    %6 = vector.broadcast %cst_5 : f32 to vector<32x128xf32>
    %7 = arith.maximumf %5, %6 : vector<32x128xf32>
    %c0_6 = arith.constant 0 : index
    %c0_7 = arith.constant 0 : index
    %8 = vector.load %arg2[%c0_6, %c0_7] : memref<16x24xf32, #tpu.memory_space<vmem>>, vector<16x24xf32>
    %c0_8 = arith.constant 0 : index
    %c0_9 = arith.constant 0 : index
    %9 = vector.load %arg5[%c0_8, %c0_9] : memref<24x128xf32, #tpu.memory_space<vmem>>, vector<24x128xf32>
    %cst_10 = arith.constant dense<0.000000e+00> : vector<16x128xf32>
    %10 = tpu.matmul %8, %9, %cst_10 {dimension_numbers = #tpu.dot_dimension_numbers<[1], [0], [0], [1], [0, 0, 1, 1], [], []>} : vector<16x24xf32>, vector<24x128xf32>, vector<16x128xf32> -> vector<16x128xf32>
    %c0_11 = arith.constant 0 : index
    %c0_12 = arith.constant 0 : index
    %11 = vector.load %arg6[%c0_11, %c0_12] : memref<1x128xf32, #tpu.memory_space<vmem>>, vector<1x128xf32>
    %12 = vector.broadcast %11 : vector<1x128xf32> to vector<16x128xf32>
    %13 = arith.addf %10, %12 : vector<16x128xf32>
    %cst_13 = arith.constant 0.000000e+00 : f32
    %14 = vector.broadcast %cst_13 : f32 to vector<16x128xf32>
    %15 = arith.maximumf %13, %14 : vector<16x128xf32>
    %c0_14 = arith.constant 0 : index
    %c0_15 = arith.constant 0 : index
    %16 = vector.load %arg7[%c0_14, %c0_15] : memref<4x128xf32, #tpu.memory_space<vmem>>, vector<4x128xf32>
    %17 = vector.shape_cast %16 : vector<4x128xf32> to vector<4x1x128xf32>
    %18 = vector.shape_cast %7 : vector<32x128xf32> to vector<1x32x128xf32>
    %19 = vector.broadcast %17 : vector<4x1x128xf32> to vector<4x32x128xf32>
    %20 = vector.broadcast %18 : vector<1x32x128xf32> to vector<4x32x128xf32>
    %21 = arith.mulf %19, %20 : vector<4x32x128xf32>
    %22 = vector.shape_cast %21 : vector<4x32x128xf32> to vector<128x128xf32>
    %cst_16 = arith.constant dense<0.000000e+00> : vector<16x128xf32>
    %23 = tpu.matmul %15, %22, %cst_16 {dimension_numbers = #tpu.dot_dimension_numbers<[1], [1], [0], [0], [0, 0, 1, 0], [], []>} : vector<16x128xf32>, vector<128x128xf32>, vector<16x128xf32> -> vector<16x128xf32>
    %c0_17 = arith.constant 0 : index
    %c0_18 = arith.constant 0 : index
    %24 = vector.load %arg8[%c0_17, %c0_18] : memref<1x128xf32, #tpu.memory_space<vmem>>, vector<1x128xf32>
    %25 = vector.broadcast %24 : vector<1x128xf32> to vector<16x128xf32>
    %26 = arith.addf %23, %25 : vector<16x128xf32>
    %c0_19 = arith.constant 0 : index
    %c0_20 = arith.constant 0 : index
    %27 = vector.load %arg10[%c0_19, %c0_20] : memref<16x128xf32, #tpu.memory_space<vmem>>, vector<16x128xf32>
    tpu.vector_store %arg10[%c0_19, %c0_20], %26 {strides = array<i32>} : memref<16x128xf32, #tpu.memory_space<vmem>>, vector<16x128xf32>,
    %c0_21 = arith.constant 0 : index
    %c0_22 = arith.constant 0 : index
    %28 = vector.load %arg7[%c0_21, %c0_22] : memref<4x128xf32, #tpu.memory_space<vmem>>, vector<4x128xf32>
    %cst_23 = arith.constant dense<0.000000e+00> : vector<128xf32>
    %29 = vector.multi_reduction <add>, %28, %cst_23 [0] : vector<4x128xf32> to vector<128xf32>
    %30 = vector.shape_cast %29 : vector<128xf32> to vector<1x128xf32>
    %31 = vector.broadcast %30 : vector<1x128xf32> to vector<32x128xf32>
    %32 = arith.mulf %7, %31 : vector<32x128xf32>
    %cst_24 = arith.constant dense<0.000000e+00> : vector<32x16xf32>
    %33 = tpu.matmul %32, %15, %cst_24 {dimension_numbers = #tpu.dot_dimension_numbers<[1], [1], [0], [0], [0, 0, 1, 0], [], []>} : vector<32x128xf32>, vector<16x128xf32>, vector<32x16xf32> -> vector<32x16xf32>
    %c0_25 = arith.constant 0 : index
    %34 = memref.load %arg0[%c0_25] : memref<1xf32, #tpu.memory_space<smem>>
    %35 = vector.broadcast %34 : f32 to vector<32x16xf32>
    %36 = arith.addf %33, %35 : vector<32x16xf32>
    %cst_26 = arith.constant dense<0.000000e+00> : vector<32x128xf32>
    %37 = tpu.matmul %36, %15, %cst_26 {dimension_numbers = #tpu.dot_dimension_numbers<[1], [0], [0], [1], [0, 0, 1, 1], [], []>} : vector<32x16xf32>, vector<16x128xf32>, vector<32x128xf32> -> vector<32x128xf32>
    %38 = arith.mulf %7, %37 : vector<32x128xf32>
    %cst_27 = arith.constant dense<0.000000e+00> : vector<128xf32>
    %39 = vector.multi_reduction <add>, %38, %cst_27 [0] : vector<32x128xf32> to vector<128xf32>
    %40 = vector.shape_cast %39 : vector<128xf32> to vector<1x128xf32>
    %c0_28 = arith.constant 0 : index
    %c0_29 = arith.constant 0 : index
    %41 = vector.load %arg9[%c0_28, %c0_29] : memref<128x32xf32, #tpu.memory_space<vmem>>, vector<128x32xf32>
    %cst_30 = arith.constant dense<0.000000e+00> : vector<1x32xf32>
    %42 = tpu.matmul %40, %41, %cst_30 {dimension_numbers = #tpu.dot_dimension_numbers<[1], [0], [0], [1], [0, 0, 1, 1], [], []>} : vector<1x128xf32>, vector<128x32xf32>, vector<1x32xf32> -> vector<1x32xf32>
    %c0_31 = arith.constant 0 : index
    %c0_32 = arith.constant 0 : index
    %43 = vector.load %arg11[%c0_31, %c0_32] : memref<1x32xf32, #tpu.memory_space<vmem>>, vector<1x32xf32>
    tpu.vector_store %arg11[%c0_31, %c0_32], %42 {strides = array<i32>} : memref<1x32xf32, #tpu.memory_space<vmem>>, vector<1x32xf32>,
    return
  }
}

</mosaic_0001>

<bundles_post_ra>
// kernel: tpu_custom_call.1
= control target key start
LH: loop header
LB: loop body
LE: loop exit
PB: predicated region body
PF: predicated region fallthrough
CT: control target
= control target key end

     0   :  { %18 = vsyncpa [#allocation4], 0  ;;  %vm55_vm0 = vcmask 261120   ;;  %s1290_s0 = inlined_call_operand.<no memory space> [shape: f32[1], index: 0, kind: input, shape index: {}]   ;;  %s1291_s1 = inlined_call_operand.vmem [shape: f32[32,32], index: 1, kind: input, shape index: {}]   ;;  %s1292_s2 = inlined_call_operand.vmem [shape: f32[16,24], index: 2, kind: input, shape index: {}]   ;;  %s1293_s3 = inlined_call_operand.vmem [shape: f32[32,128], index: 3, kind: input, shape index: {}]   ;;  %s1294_s4 = inlined_call_operand.vmem [shape: f32[1,128], index: 4, kind: input, shape index: {}]   ;;  %s1295_s5 = inlined_call_operand.vmem [shape: f32[24,128], index: 5, kind: input, shape index: {}]   ;;  %s1296_s6 = inlined_call_operand.vmem [shape: f32[1,128], index: 6, kind: input, shape index: {}]   ;;  %s1297_s7 = inlined_call_operand.vmem [shape: f32[4,128], index: 7, kind: input, shape index: {}]   ;;  %s1298_s8 = inlined_call_operand.vmem [shape: f32[1,128], index: 8, kind: input, shape index: {}]   ;;  %s1299_s9 = inlined_call_operand.vmem [shape: f32[128,32], index: 9, kind: input, shape index: {}]   ;;  %s1300_s10 = inlined_call_operand.hbm [shape: f32[16,128], index: 10, kind: output, shape index: {0}]   ;;  %s1301_s11 = inlined_call_operand.hbm [shape: f32[1,32], index: 11, kind: output, shape index: {1}]  }
   0x1   :  { %v44_v0 = vld [vmem:[%s1293_s3] sm:$0xff]  ;;  %v45_v1 = vld [vmem:[%s1293_s3 + $0x8] sm:$0xff]  ;;  %v46_v2 = vld [vmem:[%s1293_s3 + $0x10] sm:$0xff] }
   0x2   :  { %v915_v3 = vpack.c.bf16 %v45_v1, %v44_v0  ;;  %v47_v4 = vld [vmem:[%s1293_s3 + $0x18] sm:$0xff]  ;;  %v40_v5 = vld [vmem:[%s1291_s1] sm:$0xff]  ;;  %v160_v8 = vld [vmem:[%s1295_s5 + $0x8] sm:$0xff] }
   0x3   :  { %v919_v6 = vpack.c.bf16 %v47_v4, %v46_v2  ;;  %810 = vmatprep.mubr.msk.f32.mxu0 %vm55_vm0, %v40_v5  ;;  %v159_v7 = vld [vmem:[%s1295_s5] sm:$0xff] }
   0x4   :  { %916 = vmatprep.subr.bf16.mxu0 %v915_v3 }
   0x5   :  { %918 = vmatpush3.bf16.msra.mxu0 %v915_v3 }
   0x6   :  { %19 = vsyncpa [#allocation6], 0  ;;  %920 = vmatprep.subr.bf16.mxu0 %v919_v6  ;;  %v923_v9 = vpack.c.bf16 %v160_v8, %v159_v7  ;;  %v41_v10 = vld [vmem:[%s1291_s1 + $0x8] sm:$0xff]  ;;  %v42_v11 = vld [vmem:[%s1291_s1 + $0x10] sm:$0xff]  ;;  %vm169_vm1 = vcmask 195584   ;;  %vm400_vm2 = vcmask 1043456   ;;  %v266_v22 = vlaneseq }
   0x7   :  { %v161_v12 = vld [vmem:[%s1295_s5 + $0x10] sm:$0xff]  ;;  %v43_v13 = vld [vmem:[%s1291_s1 + $0x18] sm:$0xff]  ;;  %v157_v14 = vld [vmem:[%s1292_s2] sm:$0xff]  ;;  %v1047_v20 = vmov 1966171168   ;;  %vm499_vm3 = vcmask 130048  }
   0x8   :  { %v158_v15 = vld [vmem:[%s1292_s2 + $0x8] sm:$0xff]  ;;  %v399_v16 = vld [vmem:[%s1297_s7] sm:$0xf]  ;;  %v264_v21 = vunpack.c.l.s4 %v1047_v20  ;;  %v267_v25 = vshrl.u32 %v266_v22, 7  ;;  %vm1049_vm4 = vmmov 0  }
   0x9   :  { %922 = vmatpush3.bf16.msra.mxu0 %v919_v6  ;;  %v401_v17 = vsel %vm400_vm2, %v399_v16, 0.0  ;;  %v736_v28 = vld.sshfl [vmem:[%s1297_s7] sm:$0x33 pattern:$0x75316420] }
   0xa   :  { %924 = vmatprep.subr.bf16.mxu0 %v923_v9  ;;  %v402_v18 = vrot.slane %v401_v17, 4  ;;  %v265_v24 = vunpack.c.0.s8 %v264_v21  ;;  %v1164_v29 = vsub.s32 0, %v267_v25  ;;  %v728_v30 = vld [vmem:[%s1294_s4] ss:$0 sm:$0xff]  ;;  %v262_v42 = vcombine.high %v736_v28, %v736_v28 }
   0xb   :  { %v733_v47 = vld [vmem:[%s1296_s6] ss:$0 sm:$0xff] }
   0xc   :  { %811 = vmatmul.mubr.msk.f32.vlgmr.msra.gmra.mrb[0].mxu0 %vm55_vm0, %v41_v10  ;;  %v403_v19 = vadd.f32 %v402_v18, %v401_v17  ;;  %v268_v27 = vsub.s32 %v265_v24, %v267_v25 }
   0xd   :  { %926 = vmatpush3.bf16.msra.mxu0 %v923_v9  ;;  %813 = vmatprep.mubr.msk.f32.mxu0 %vm55_vm0, %v42_v11 }
   0xe   :  { %820 = vmatprep.subr.mxu0 %v161_v12  ;;  %v404_v23 = vrot.slane %v403_v19, 2  ;;  %v269_v32 = vrot.slane %v736_v28, %v268_v27  ;;  %v276_v54 = vrot.slane %v262_v42, %v268_v27  ;;  %v413_v27 = vstv %s1290_s0  ;;  %v610_v28 = vld [vmem:[%s1299_s9] sm:$0xff] }
  0x10   :  { %814 = vmatmul.mubr.msk.f32.gmra.mrb[2].mxu0 %vm55_vm0, %v43_v13  ;;  %v405_v26 = vadd.f32 %v404_v23, %v403_v19  ;;  %v282_v36 = vrot.slane %v269_v32, %v1164_v29  ;;  %v286_v60 = vrot.slane %v276_v54, %v1164_v29  ;;  %v277_v4 = vcombine.high %v269_v32, %v269_v32 }
  0x11   :  { %821 = vmatpush3.msra.mxu0 %v161_v12  ;;  %822 = vmatprep.mubr.msk.f32.mxu0 %vm169_vm1, %v157_v14  ;;  %v278_v17 = vcombine.high %v276_v54, %v276_v54  ;;  %v616_v54 = vld [vmem:[%s1299_s9 + $0x30] sm:$0xff] }
  0x12   :  { %v406_v31 = vrot.slane %v405_v26, 1  ;;  %v290_v11 = vrot.slane %v277_v4, %v1164_v29 }
  0x13   :  { %v294_v19 = vrot.slane %v278_v17, %v1164_v29  ;;  %v611_v29 = vld [vmem:[%s1299_s9 + $0x8] sm:$0xff] }
  0x14   :  { %823 = vmatmul.mubr.msk.f32.vlgmr.msra.gmra.mrb[4].mxu0 %vm169_vm1, %v158_v15  ;;  %v407_v38 = vadd.f32 %v406_v31, %v405_v26  ;;  %v1048_v26 = vmov 0.0|0.0  }
  0xdf   :  { %v812_v33 = vpop.f32.mrb[0].mxu0 }
  0xe0   :  { %v140_v34 = vadd.f32 %v812_v33, %v728_v30  ;;  %v134_v35 = vpop.f32.mrb[1].mxu0  ;;  %v968_v33 = vpack.c.bf16 %v611_v29, %v610_v28 }
  0xe1   :  { %v135_v37 = vadd.f32 %v728_v30, %v134_v35  ;;  %v612_v35 = vld [vmem:[%s1299_s9 + $0x10] sm:$0xff] }
  0xe2   :  { %v1170_v39 = vmax.f32 %v140_v34, 0.0 }
  0xe3   :  { %v1172_v40 = vmax.f32 %v135_v37, 0.0  ;;  %v815_v41 = vpop.f32.mrb[2].mxu0 }
  0xe4   :  { %v150_v43 = vadd.f32 %v815_v41, %v728_v30  ;;  %v144_v44 = vpop.f32.mrb[3].mxu0  ;;  %v300_v45 = vmul.f32 %v282_v36, %v1170_v39  ;;  %v304_v2 = vmul.f32 %v286_v60, %v1170_v39  ;;  %v409_v5 = vmul.f32 %v407_v38, %v1170_v39 }
  0xe5   :  { %v145_v46 = vadd.f32 %v728_v30, %v144_v44  ;;  %v408_v48 = vmul.f32 %v407_v38, %v1172_v40  ;;  %v299_v49 = vmul.f32 %v282_v36, %v1172_v40  ;;  %v303_v1 = vmul.f32 %v286_v60, %v1172_v40  ;;  %v737_v44 = vld [vmem:[%s1298_s8] ss:$0 sm:$0xff] }
  0xe6   :  { %v1180_v50 = vmax.f32 %v150_v43, 0.0  ;;  %v307_v12 = vmul.f32 %v290_v11, %v1172_v40  ;;  %v308_v13 = vmul.f32 %v290_v11, %v1170_v39  ;;  %v311_v20 = vmul.f32 %v294_v19, %v1172_v40 }
  0xe7   :  { %v1182_v51 = vmax.f32 %v145_v46, 0.0  ;;  %v824_v52 = vpop.f32.mrb[4].mxu0  ;;  %864 = vmatprep.mubr.f32.mxu0 %v408_v48  ;;  %v927_v53 = vpack.c.bf16 %v300_v45, %v299_v49  ;;  %v935_v3 = vpack.c.bf16 %v304_v2, %v303_v1  ;;  %v312_v21 = vmul.f32 %v294_v19, %v1170_v39  ;;  %v614_v49 = vld [vmem:[%s1299_s9 + $0x20] sm:$0xff]  ;;  %v624_v2 = vld [vmem:[%s1299_s9 + $0x70] sm:$0xff] }
  0xe8   :  { %v248_v55 = vadd.f32 %v824_v52, %v733_v47  ;;  %v242_v56 = vpop.f32.mrb[5].mxu0  ;;  %v302_v57 = vmul.f32 %v282_v36, %v1180_v50  ;;  %v306_v7 = vmul.f32 %v286_v60, %v1180_v50  ;;  %v411_v10 = vmul.f32 %v407_v38, %v1180_v50  ;;  %v615_v52 = vld [vmem:[%s1299_s9 + $0x28] sm:$0xff] }
  0xe9   :  { %v243_v58 = vadd.f32 %v733_v47, %v242_v56  ;;  %928 = vmatprep.subr.bf16.mxu1 %v927_v53  ;;  %v301_v59 = vmul.f32 %v282_v36, %v1182_v51  ;;  %v305_v6 = vmul.f32 %v286_v60, %v1182_v51  ;;  %v410_v8 = vmul.f32 %v407_v38, %v1182_v51  ;;  %v613_v36 = vld [vmem:[%s1299_s9 + $0x18] sm:$0xff]  ;;  %v620_v60 = vld [vmem:[%s1299_s9 + $0x50] sm:$0xff] }
  0xea   :  { %v252_v61 = vmax.f32 %v248_v55, 0.0  ;;  %930 = vmatpush3.bf16.xpose.msra.mxu1 %v927_v53  ;;  %v943_v14 = vpack.c.bf16 %v308_v13, %v307_v12  ;;  %v309_v15 = vmul.f32 %v290_v11, %v1182_v51  ;;  %v310_v16 = vmul.f32 %v290_v11, %v1180_v50  ;;  %v617_v55 = vld [vmem:[%s1299_s9 + $0x38] sm:$0xff] }
  0xeb   :  { %v251_v62 = vmax.f32 %v243_v58, 0.0  ;;  %v931_v63 = vpack.c.bf16 %v302_v57, %v301_v59  ;;  %v939_v9 = vpack.c.bf16 %v306_v7, %v305_v6  ;;  %v951_v22 = vpack.c.bf16 %v312_v21, %v311_v20  ;;  %v618_v57 = vld [vmem:[%s1299_s9 + $0x40] sm:$0xff]  ;;  %v619_v58 = vld [vmem:[%s1299_s9 + $0x48] sm:$0xff] }
  0xec   :  { %v947_v18 = vpack.c.bf16 %v310_v16, %v309_v15  ;;  %v313_v23 = vmul.f32 %v294_v19, %v1182_v51  ;;  %v314_v24 = vmul.f32 %v294_v19, %v1180_v50  ;;  %v971_v42 = vpack.c.bf16 %v613_v36, %v612_v35 }
  0xed   :  { %v959_v0 = vpack.c.bf16 %v252_v61, %v251_v62  ;;  %932 = vmatprep.subr.bf16.mxu1 %v931_v63  ;;  %857 = vmatprep.mubr.f32.mxu1 %v251_v62  ;;  %v974_v53 = vpack.c.bf16 %v615_v52, %v614_v49  ;;  %v977_v56 = vpack.c.bf16 %v617_v55, %v616_v54 }
  0xee   :  { %v955_v25 = vpack.c.bf16 %v314_v24, %v313_v23  ;;  %v980_v59 = vpack.c.bf16 %v619_v58, %v618_v57 }
  0xef   :  { %960 = vmatprep.subr.bf16.mxu0 %v959_v0 }
  0xf0   :  { %962 = vmatpush3.bf16.xpose.msra.mxu0 %v959_v0 }
  0xf1   :  { %964 = vmatprep.subr.bf16.mxu0 %v959_v0 }
  0xf2   :  { %934 = vmatpush3.bf16.xpose.msra.mxu1 %v931_v63  ;;  %v622_v63 = vld [vmem:[%s1299_s9 + $0x60] sm:$0xff] }
  0xf3   :  { %936 = vmatprep.subr.bf16.mxu1 %v935_v3 }
  0xf7   :  { %865 = vmatmul.mubr.f32.vlgmr.msra.gmra.mrb[6].mxu0 %v409_v5  ;;  %v1050_v5 = vmov 0.0  }
  0xf8   :  { %867 = vmatprep.mubr.f32.mxu0 %v410_v8  ;;  %966 = vmatpush3.bf16.msra.mxu0 %v959_v0  ;;  %v623_v0 = vld [vmem:[%s1299_s9 + $0x68] sm:$0xff] }
  0xf9   :  { %967 = vmatprep.subr.bf16.mxu0 %v1048_v26  ;;  %v986_v1 = vpack.c.bf16 %v623_v0, %v622_v63 }
  0xfa   :  { %938 = vmatpush3.bf16.xpose.msra.mxu1 %v935_v3  ;;  %v625_v3 = vld [vmem:[%s1299_s9 + $0x78] sm:$0xff] }
  0xfb   :  { %940 = vmatprep.subr.bf16.mxu1 %v939_v9  ;;  %868 = vmatmul.mubr.f32.gmra.mrb[8].mxu0 %v411_v10  ;;  %v989_v4 = vpack.c.bf16 %v625_v3, %v624_v2 }
 0x102   :  { %942 = vmatpush3.bf16.xpose.msra.mxu1 %v939_v9 }
 0x103   :  { %944 = vmatprep.subr.bf16.mxu1 %v943_v14 }
 0x10a   :  { %946 = vmatpush3.bf16.xpose.msra.mxu1 %v943_v14 }
 0x10b   :  { %948 = vmatprep.subr.bf16.mxu1 %v947_v18 }
 0x112   :  { %950 = vmatpush3.bf16.xpose.msra.mxu1 %v947_v18 }
 0x113   :  { %952 = vmatprep.subr.bf16.mxu1 %v951_v22 }
 0x11a   :  { %954 = vmatpush3.bf16.xpose.msra.mxu1 %v951_v22 }
 0x11b   :  { %956 = vmatprep.subr.bf16.mxu1 %v955_v25 }
 0x122   :  { %958 = vmatpush3.bf16.xpose.msra.mxu1 %v955_v25 }
 0x129   :  { %858 = vmatmul.mubr.f32.vlgmr.msra.gmra.mrb[0].mxu1 %v252_v61  ;;  %v621_v61 = vld [vmem:[%s1299_s9 + $0x58] sm:$0xff]  ;;  %s1051_s9 = smov [#allocation3]  }
 0x12a   :  { %v983_v62 = vpack.c.bf16 %v621_v61, %v620_v60  ;;  %s703_s13 = sshll.u32 %s1051_s9, 4  ;;  %s704_s13 = int_to_ptr.vmem [resolvable:$true] %s703_s13 }
 0x12b   :  { %s999_s0 = scalar_lea.vmem %s704_s13, 256  ;;  %p1004_p1 = scmp.lt.s32.totalorder %s704_s13, %s704_s13 }
 0x12c   :  { %p1000_p0 = scmp.ne.s32.totalorder %s704_s13, %s999_s0  ;;  %p1005_p2 = scmp.lt.s32.totalorder %s999_s0, %s999_s0 }
 0x12e   :  { %p1006_p3 = por %p1005_p2, %p1004_p1 }
 0x130   :  { %p1007_p4 = pnand %p1006_p3, %p1000_p0 }
 0x1ca   :  { %v866_v30 = vpop.f32.mrb[6].mxu0 }
 0x1cb   :  { %v480_v31 = vpop.f32.mrb[7].mxu0  ;;  %v486_v34 = vadd.f32 %v866_v30, %v413_v27 }
 0x1cc   :  { %v481_v32 = vadd.f32 %v480_v31, %v413_v27 }
 0x1ce   :  { %v869_v37 = vpop.f32.mrb[8].mxu0  ;;  %874 = vmatprep.mubr.msk.f32.mxu0 %vm499_vm3, %v481_v32 }
 0x1cf   :  { %v490_v38 = vpop.f32.mrb[9].mxu0  ;;  %875 = vmatmul.mubr.msk.f32.vlgmr.msra.gmra.mrb[10].mxu0 %vm499_vm3, %v486_v34  ;;  %v496_v43 = vadd.f32 %v869_v37, %v413_v27 }
 0x1d0   :  { %v491_v41 = vadd.f32 %v490_v38, %v413_v27  ;;  %969 = vmatpush3.bf16.msra.mxu0 %v968_v33 }
 0x1d1   :  { %970 = vmatprep.subr.bf16.mxu0 %v1048_v26 }
 0x1d2   :  { %877 = vmatprep.mubr.msk.f32.mxu0 %vm499_vm3, %v491_v41 }
 0x1d3   :  { %878 = vmatmul.mubr.msk.f32.gmra.mrb[12].mxu0 %vm499_vm3, %v496_v43 }
 0x1d4   :  { %972 = vmatpush3.bf16.msra.mxu0 %v971_v42  ;;  %912 = vmatprep.mubr.msk.f32.mxu0 %vm1049_vm4, %v1050_v5 }
 0x1d5   :  { %973 = vmatprep.subr.bf16.mxu0 %v1048_v26 }
 0x1d8   :  { %975 = vmatpush3.bf16.msra.mxu0 %v974_v53 }
 0x1d9   :  { %976 = vmatprep.subr.bf16.mxu0 %v1048_v26 }
 0x1dc   :  { %978 = vmatpush3.bf16.msra.mxu0 %v977_v56 }
 0x1dd   :  { %979 = vmatprep.subr.bf16.mxu0 %v1048_v26 }
 0x1e0   :  { %981 = vmatpush3.bf16.msra.mxu0 %v980_v59 }
 0x1e1   :  { %982 = vmatprep.subr.bf16.mxu0 %v1048_v26 }
 0x1e4   :  { %984 = vmatpush3.bf16.msra.mxu0 %v983_v62 }
 0x1e5   :  { %985 = vmatprep.subr.bf16.mxu0 %v1048_v26 }
 0x1e8   :  { %987 = vmatpush3.bf16.msra.mxu0 %v986_v1 }
 0x1e9   :  { %988 = vmatprep.subr.bf16.mxu0 %v1048_v26 }
 0x1ec   :  { %990 = vmatpush3.bf16.msra.mxu0 %v989_v4 }
 0x1fc   :  { %v859_v45 = vpop.f32.mrb[0].mxu1 }
 0x1fd   :  { %v394_v46 = vadd.f32 %v859_v45, %v737_v44  ;;  %v388_v47 = vpop.f32.mrb[1].mxu1 }
 0x1fe   :  { %v389_v48 = vadd.f32 %v737_v44, %v388_v47 }
 0x1ff   :  { %398 = vst [vmem:[#allocation3 + $0x8] sm:$0xff] %v394_v46 }
 0x200   :  { %397 = vst [vmem:[#allocation3] sm:$0xff] %v389_v48 }
 0x2a2   :  { %v876_v6 = vpop.f32.mrb[10].mxu0 }
 0x2a3   :  { %v598_v7 = vmul.f32 %v876_v6, %v1170_v39  ;;  %v578_v8 = vpop.f32.mrb[11].mxu0 }
 0x2a4   :  { %v597_v9 = vmul.f32 %v578_v8, %v1172_v40 }
 0x2a6   :  { %v601_v10 = vadd.f32 %v598_v7, %v597_v9  ;;  %v879_v11 = vpop.f32.mrb[12].mxu0 }
 0x2a7   :  { %v588_v12 = vpop.f32.mrb[13].mxu0  ;;  %v600_v14 = vmul.f32 %v879_v11, %v1180_v50 }
 0x2a8   :  { %v599_v13 = vmul.f32 %v588_v12, %v1182_v51 }
 0x2aa   :  { %v602_v15 = vadd.f32 %v601_v10, %v599_v13 }
 0x2ac   :  { %v603_v16 = vadd.f32 %v602_v15, %v600_v14 }
 0x2ae   :  { %v604_v17 = vrot.slane %v603_v16, 4 }
 0x2b0   :  { %v605_v18 = vadd.f32 %v604_v17, %v603_v16 }
 0x2b2   :  { %v606_v19 = vrot.slane %v605_v18, 2 }
 0x2b4   :  { %v607_v20 = vadd.f32 %v606_v19, %v605_v18 }
 0x2b6   :  { %v608_v21 = vrot.slane %v607_v20, 1 }
 0x2b8   :  { %v609_v22 = vadd.f32 %v608_v21, %v607_v20 }
 0x2ba   :  { %913 = vmatmul.mubr.f32.vlgmr.msra.gmra.mrb[14].mxu0 %v609_v22 }
 0x2bb   :  { %1010 = shalt.err (!%p1007_p4)
}
 0x2bc   :  { %s1011_s16 = scalar_lea.hbm %s1300_s10, 256 }
 0x2bd   :  { %p1012_p5 = scmp.ne.s32.totalorder %s1300_s10, %s1011_s16  ;;  %p1015_p6 = scmp.lt.u32.totalorder %s1011_s16, %s1300_s10 }
 0x2bf   :  { %p1017_p7 = pnand %p1015_p6, %p1012_p5 }
 0x2c1   :  { %1020 = shalt.err (!%p1017_p7)
}
 0x2c2   :  { %s1052_s5 = smov 128   ;;  %s1053_s8 = smov 8   ;;  %vm696_vm5 = vcmask 253952  }
 0x2c3   :  { %709 = dma.vmem_to_hbm [thread:$0]  %s704_s13, 256, %s1300_s10, [#allocation4], %s1052_s5, %s1052_s5, %s1053_s8  }
 0x2c4   :  { %s1054_s23 = smov [#allocation5]  }
 0x2c5   :  { %s716_s1 = sshll.u32 %s1054_s23, 4  ;;  %s717_s1 = int_to_ptr.vmem [resolvable:$true] %s716_s1 }
 0x2c6   :  { %s1021_s24 = scalar_lea.vmem %s717_s1, 16  ;;  %s1025_s2 = scalar_lea.vmem %s717_s1, 32 }
 0x2c7   :  { %p1022_p8 = scmp.ne.s32.totalorder %s717_s1, %s1021_s24  ;;  %p1026_p9 = scmp.lt.s32.totalorder %s717_s1, %s717_s1 }
 0x2c8   :  { %p1027_p10 = scmp.lt.s32.totalorder %s1025_s2, %s1021_s24 }
 0x2ca   :  { %p1028_p11 = por %p1027_p10, %p1026_p9 }
 0x2cc   :  { %p1029_p12 = pnand %p1028_p11, %p1022_p8 }
 0x38d   :  { %v692_v39 = vpop.f32.mrb[14].mxu0 }
 0x38e   :  { %697 = vst.msk [vmem:[#allocation5] sm:$0x1] %vm696_vm5, %v692_v39  ;;  %v914_v40 = vpop.f32.mrb[15].mxu0 }
 0x38f   :  { %1032 = shalt.err (!%p1029_p12)
}
 0x390   :  { %s1033_s7 = scalar_lea.hbm %s1301_s11, 16 }
 0x391   :  { %p1034_p13 = scmp.ne.s32.totalorder %s1301_s11, %s1033_s7  ;;  %p1037_p0 = scmp.lt.u32.totalorder %s1033_s7, %s1301_s11 }
 0x393   :  { %p1039_p1 = pnand %p1037_p0, %p1034_p13 }
 0x395   :  { %1042 = shalt.err (!%p1039_p1)
}
 0x396   :  { %719 = dma.vmem_to_hbm [thread:$0]  %s717_s1, 16, %s1301_s11, [#allocation6]  }
 0x397   :  { %1043 = dma.done.wait [#allocation4], 256  }
 0x398   :  { %1044 = vsyncadd [#allocation4], 4294967040 }
 0x399   :  { %1045 = dma.done.wait [#allocation6], 16  }
 0x39a   :  { %1046 = vsyncadd [#allocation6], 4294967280 }
 0x39b   :  { %726 = vsyncpa [#allocation4], 1 }
 0x39c   :  { %727 = vsyncpa [#allocation6], 1 }

</bundles_post_ra>
